<compile_context>
chip_gen: v7x
topology: tpu7x:2x2x1
jax: 0.10.0
libtpu: 0.0.40
codegen_flags: <defaults>
</compile_context>

<pallas_src>
import jax
import jax.numpy as jnp
from jax.experimental import pallas as pl
from jax.experimental.pallas import tpu as pltpu


# --------------------------------------------------------------------------
# Kernels
# --------------------------------------------------------------------------
def _residual_kernel(x_ref, wt_ref, b_ref, o_ref):
    """Eval / drop==0 path: out = x + x @ Wt + b for one (tile_n, C) tile.

    x_ref  : (tile_n, C) activation tile (flattened B*N rows).
    wt_ref : (C, C) weight, already transposed to (in, out) in the wrapper.
    b_ref  : (1, C) f32 bias (resident).
    """
    x = x_ref[...]
    y = jnp.dot(x, wt_ref[...], preferred_element_type=jnp.float32)
    y = y + b_ref[...]
    o_ref[...] = (x.astype(jnp.float32) + y).astype(o_ref.dtype)


def _residual_drop_kernel(keep_ref, x_ref, wt_ref, b_ref, o_ref):
    """Training drop-path: out = x + (x @ Wt + b) * keep[b], per-sample tiles.

    keep_ref : (B,) f32 in SMEM (scalar prefetch) — per-sample keep factor.
    x_ref    : (tile_n, C) tile of one batch sample (batch dim squeezed).
    """
    keep = keep_ref[pl.program_id(0)]            # scalar from SMEM
    x = x_ref[...]
    y = jnp.dot(x, wt_ref[...], preferred_element_type=jnp.float32)
    y = (y + b_ref[...]) * keep
    o_ref[...] = (x.astype(jnp.float32) + y).astype(o_ref.dtype)


# --------------------------------------------------------------------------
# Tiling / VMEM budgeting (generation-aware)
# --------------------------------------------------------------------------
def _vmem_params():
    """(vmem_limit_bytes, accounting_budget_bytes) derived from the chip.

    v5e/v6e: 128 MiB physical VMEM -> limit capped at 96 MiB.
    v7x    : 64 MiB physical       -> limit ~56 MiB.
    Budget leaves ~25% headroom under the limit for compiler scratch/spills.
    """
    try:
        cap = int(pltpu.get_tpu_info().vmem_capacity_bytes)
    except Exception:
        cap = 64 * 1024 * 1024                 # conservative fallback (v7x)
    limit = min(cap * 7 // 8, 96 * 1024 * 1024)
    budget = limit * 3 // 4
    return int(limit), int(budget)


def _pick_tile_n(n_rows, C, act_dtype, w_dtype, budget, *, max_tile=2048):
    """Largest row tile (sublane multiple, <= max_tile) fitting `budget`.

    Accounts for: double-buffered x-in and out streams, the resident
    double-buffered (C,C) weight + (1,C) f32 bias, and the f32 tile
    temporaries (matmul result + upcast x).
    """
    act_bytes = jnp.dtype(act_dtype).itemsize
    w_bytes = jnp.dtype(w_dtype).itemsize
    sublane = {4: 8, 2: 16, 1: 32}.get(act_bytes, 8)

    resident = 2 * C * C * w_bytes + 2 * C * 4           # weight + bias (x2 bufs)
    per_row = 2 * 2 * C * act_bytes + 2 * C * 4          # streams + f32 temps
    avail = max(budget - resident, sublane * per_row)
    cap = max(sublane, (avail // per_row) // sublane * sublane)
    tile = int(min(max_tile, cap))
    if n_rows <= tile:
        # One block spanning the full row extent ("equal full dim" blocks are
        # always legal), so no edge masking at all for small inputs.
        return int(n_rows)
    return tile


# --------------------------------------------------------------------------
# Forward wrapper
# --------------------------------------------------------------------------
def residual_forward(x, weight, bias, *, drop=0.0, training=False, key=None):
    """Pallas forward for LeViT Residual(m=Linear(C, C), drop).

    x: (B, N, C).  weight: (C, C) torch Linear layout (out, in).  bias: (C,).
    Activations may be f32 or bf16; the matmul always accumulates in f32.
    """
    B, N, C = x.shape
    dtype = x.dtype

    # One-time XLA transpose: (out, in) -> (in, out) so the kernel feeds the
    # MXU with the canonical contraction (no per-step RHS transpose).
    wt = jnp.asarray(weight).T.astype(dtype)
    b2 = jnp.asarray(bias).reshape(1, C).astype(jnp.float32)

    vmem_limit, budget = _vmem_params()

    if training and drop > 0:
        # Per-sample keep factor: torch.rand(B,1,1).ge_(drop).div(1-drop).
        # TODO(synk): torch.rand's exact RNG stream cannot be replicated in
        # JAX; jax.random is used with identical masking semantics.
        assert key is not None, "training drop path needs a PRNG key"
        u = jax.random.uniform(key, (B,), dtype=jnp.float32)
        keep = (u >= drop).astype(jnp.float32) / (1.0 - drop)

        tile_n = _pick_tile_n(N, C, dtype, wt.dtype, budget)
        grid = (B, pl.cdiv(N, tile_n))
        return pl.pallas_call(
            _residual_drop_kernel,
            out_shape=jax.ShapeDtypeStruct((B, N, C), dtype),
            grid_spec=pltpu.PrefetchScalarGridSpec(
                num_scalar_prefetch=1,                 # keep -> SMEM
                grid=grid,
                in_specs=[
                    pl.BlockSpec((None, tile_n, C), lambda b, t, keep_ref: (b, t, 0)),
                    pl.BlockSpec((C, C), lambda b, t, keep_ref: (0, 0)),
                    pl.BlockSpec((1, C), lambda b, t, keep_ref: (0, 0)),
                ],
                out_specs=pl.BlockSpec(
                    (None, tile_n, C), lambda b, t, keep_ref: (b, t, 0)),
            ),
            compiler_params=pltpu.CompilerParams(
                dimension_semantics=("parallel", "parallel"),
                vmem_limit_bytes=vmem_limit),
        )(keep, x, wt, b2)

    # Eval / drop == 0: keep == 1 for every sample, so flatten (B, N, C) ->
    # (B*N, C) (free reshape) and tile over rows only — large lane-dense
    # tiles, few grid steps, no pad / slice HBM round-trips.
    rows = B * N
    x2 = x.reshape(rows, C)
    tile_n = _pick_tile_n(rows, C, dtype, wt.dtype, budget)
    grid = (pl.cdiv(rows, tile_n),)

    out = pl.pallas_call(
        _residual_kernel,
        out_shape=jax.ShapeDtypeStruct((rows, C), dtype),
        grid=grid,
        in_specs=[
            pl.BlockSpec((tile_n, C), lambda t: (t, 0)),
            pl.BlockSpec((C, C), lambda t: (0, 0)),
            pl.BlockSpec((1, C), lambda t: (0, 0)),
        ],
        out_specs=pl.BlockSpec((tile_n, C), lambda t: (t, 0)),
        compiler_params=pltpu.CompilerParams(
            dimension_semantics=("parallel",),
            vmem_limit_bytes=vmem_limit),
    )(x2, wt, b2)
    return out.reshape(B, N, C)


# --------------------------------------------------------------------------
# Self-check
# --------------------------------------------------------------------------
if __name__ == "__main__":
    # Small deterministic shapes consistent with LeViT sequence tensors.
    B, N, C = 2, 8, 32
    key = jax.random.PRNGKey(0)
    kx, kw, kb, kd = jax.random.split(key, 4)

    x = jax.random.normal(kx, (B, N, C), dtype=jnp.float32)
    weight = jax.random.normal(kw, (C, C), dtype=jnp.float32) * 0.05
    bias = jax.random.normal(kb, (C,), dtype=jnp.float32) * 0.05

    # Eval-mode forward: x + m(x).
    out = jax.block_until_ready(residual_forward(x, weight, bias))
    ref = x + (jnp.einsum("bnc,dc->bnd", x, weight) + bias)
    assert jnp.allclose(out, ref, atol=1e-5, rtol=1e-5), "eval mismatch"

    # Token count that is not a sublane/tile multiple (exercises the
    # non-divisible path without any wrapper padding).
    N2 = 13
    x2 = jax.random.normal(kx, (B, N2, C), dtype=jnp.float32)
    out2 = jax.block_until_ready(residual_forward(x2, weight, bias))
    ref2 = x2 + (jnp.einsum("bnc,dc->bnd", x2, weight) + bias)
    assert jnp.allclose(out2, ref2, atol=1e-5, rtol=1e-5), "non-divisible mismatch"

    # Training drop-path branch (same keep semantics as torch).
    drop = 0.3
    out3 = jax.block_until_ready(
        residual_forward(x, weight, bias, drop=drop, training=True, key=kd))
    u = jax.random.uniform(kd, (B,), dtype=jnp.float32)
    keep = (u >= drop).astype(jnp.float32) / (1.0 - drop)
    ref3 = x + (jnp.einsum("bnc,dc->bnd", x, weight) + bias) * keep[:, None, None]
    assert jnp.allclose(out3, ref3, atol=1e-5, rtol=1e-5), "train mismatch"

    print("KERNEL_OK")
</pallas_src>

<mosaic_0001>
module attributes {stable_mosaic.version = 11 : i64} {
  func.func @_residual_kernel(%arg0: i32, %arg1: memref<16x32xf32, #tpu.memory_space<vmem>>, %arg2: memref<32x32xf32, #tpu.memory_space<vmem>>, %arg3: memref<1x32xf32, #tpu.memory_space<vmem>>, %arg4: memref<16x32xf32, #tpu.memory_space<vmem>>) attributes {dimension_semantics = [#tpu.dimension_semantics<parallel>], iteration_bounds = array<i64: 1>, scalar_prefetch = 0 : i64, scratch_operands = 0 : i64, tpu.core_type = #tpu.core_type<tc>, window_params = [{transform_indices = @transform_0, window_bounds = array<i64: 16, 32>}, {pipeline_mode = #tpu.pipeline_mode<synchronous>, transform_indices = @transform_1, window_bounds = array<i64: 32, 32>}, {pipeline_mode = #tpu.pipeline_mode<synchronous>, transform_indices = @transform_2, window_bounds = array<i64: 1, 32>}, {transform_indices = @transform_3, window_bounds = array<i64: 16, 32>}]} {
    %c0 = arith.constant 0 : index
    %c0_0 = arith.constant 0 : index
    %0 = vector.load %arg1[%c0, %c0_0] : memref<16x32xf32, #tpu.memory_space<vmem>>, vector<16x32xf32>
    %c0_1 = arith.constant 0 : index
    %c0_2 = arith.constant 0 : index
    %1 = vector.load %arg2[%c0_1, %c0_2] : memref<32x32xf32, #tpu.memory_space<vmem>>, vector<32x32xf32>
    %cst = arith.constant dense<0.000000e+00> : vector<16x32xf32>
    %2 = tpu.matmul %0, %1, %cst {dimension_numbers = #tpu.dot_dimension_numbers<[1], [0], [0], [1], [0, 0, 1, 1], [], []>} : vector<16x32xf32>, vector<32x32xf32>, vector<16x32xf32> -> vector<16x32xf32>
    %c0_3 = arith.constant 0 : index
    %c0_4 = arith.constant 0 : index
    %3 = vector.load %arg3[%c0_3, %c0_4] : memref<1x32xf32, #tpu.memory_space<vmem>>, vector<1x32xf32>
    %4 = vector.broadcast %3 : vector<1x32xf32> to vector<16x32xf32>
    %5 = arith.addf %2, %4 : vector<16x32xf32>
    %6 = arith.addf %0, %5 : vector<16x32xf32>
    %c0_5 = arith.constant 0 : index
    %c0_6 = arith.constant 0 : index
    %7 = vector.load %arg4[%c0_5, %c0_6] : memref<16x32xf32, #tpu.memory_space<vmem>>, vector<16x32xf32>
    tpu.vector_store %arg4[%c0_5, %c0_6], %6 {strides = array<i32>} : memref<16x32xf32, #tpu.memory_space<vmem>>, vector<16x32xf32>,
    return
  }
  func.func @transform_0(%arg0: i32) -> (i32, i32) {
    %c0_i32 = arith.constant 0 : i32
    %c0_i32_0 = arith.constant 0 : i32
    return %arg0, %c0_i32 : i32, i32
  }
  func.func @transform_1(%arg0: i32) -> (i32, i32) {
    %c0_i32 = arith.constant 0 : i32
    %c0_i32_0 = arith.constant 0 : i32
    %c0_i32_1 = arith.constant 0 : i32
    return %c0_i32, %c0_i32_0 : i32, i32
  }
  func.func @transform_2(%arg0: i32) -> (i32, i32) {
    %c0_i32 = arith.constant 0 : i32
    %c0_i32_0 = arith.constant 0 : i32
    %c0_i32_1 = arith.constant 0 : i32
    return %c0_i32, %c0_i32_0 : i32, i32
  }
  func.func @transform_3(%arg0: i32) -> (i32, i32) {
    %c0_i32 = arith.constant 0 : i32
    %c0_i32_0 = arith.constant 0 : i32
    return %arg0, %c0_i32 : i32, i32
  }
}

</mosaic_0001>

<bundles_post_ra>
// kernel: tpu_custom_call.1
= control target key start
LH: loop header
LB: loop body
LE: loop exit
PB: predicated region body
PF: predicated region fallthrough
CT: control target
= control target key end

     0   :  { %8 = vsyncpa [#allocation3], 0  ;;  %s342_s0 = inlined_call_operand.hbm [shape: f32[16,32], index: 0, kind: input, shape index: {}]   ;;  %s343_s1 = inlined_call_operand.hbm [shape: f32[32,32], index: 1, kind: input, shape index: {}]   ;;  %s344_s2 = inlined_call_operand.vmem [shape: f32[1,32], index: 2, kind: input, shape index: {}]   ;;  %s345_s3 = inlined_call_operand.hbm [shape: f32[16,32], index: 3, kind: output, shape index: {}]  }
   0x1   :  { %9 = vsyncpa [#allocation6], 0 }
   0x2   :  { %10 = vsyncpa [#allocation4], 0  ;;  %s265_s12 = smov [#allocation2]   ;;  %s193_s16 = scalar_lea.hbm %s342_s0, 256 }
   0x3   :  { %s16_s13 = sshll.u32 %s265_s12, 4  ;;  %p194_p0 = scmp.ne.s32.totalorder %s342_s0, %s193_s16  ;;  %s17_s13 = int_to_ptr.vmem [resolvable:$true] %s16_s13 }
   0x4   :  { %p197_p1 = scmp.lt.u32.totalorder %s193_s16, %s342_s0 }
   0x6   :  { %p199_p2 = pnand %p197_p1, %p194_p0 }
   0x8   :  { %202 = shalt.err (!%p199_p2)
}
   0x9   :  { %s203_s21 = scalar_lea.vmem %s17_s13, 256  ;;  %p208_p4 = scmp.lt.s32.totalorder %s17_s13, %s17_s13 }
   0xa   :  { %p204_p3 = scmp.ne.s32.totalorder %s17_s13, %s203_s21  ;;  %p209_p5 = scmp.lt.s32.totalorder %s203_s21, %s203_s21 }
   0xc   :  { %p210_p6 = por %p209_p5, %p208_p4 }
   0xe   :  { %p211_p7 = pnand %p210_p6, %p204_p3 }
  0x10   :  { %214 = shalt.err (!%p211_p7)
}
  0x11   :  { %s266_s22 = smov 128   ;;  %s267_s23 = smov 8  }
  0x12   :  { %22 = dma.hbm_to_vmem [thread:$0]  %s342_s0, 256, %s17_s13, [#allocation3], %s266_s22, %s266_s22, %s267_s23  }
  0x13   :  { %s268_s26 = smov [#allocation5]   ;;  %s215_s30 = scalar_lea.hbm %s343_s1, 512 }
  0x14   :  { %s28_s27 = sshll.u32 %s268_s26, 4  ;;  %p216_p8 = scmp.ne.s32.totalorder %s343_s1, %s215_s30  ;;  %s29_s27 = int_to_ptr.vmem [resolvable:$true] %s28_s27 }
  0x15   :  { %p219_p9 = scmp.lt.u32.totalorder %s215_s30, %s343_s1 }
  0x17   :  { %p221_p10 = pnand %p219_p9, %p216_p8 }
  0x19   :  { %224 = shalt.err (!%p221_p10)
}
  0x1a   :  { %s225_s8 = scalar_lea.vmem %s29_s27, 512  ;;  %p230_p12 = scmp.lt.s32.totalorder %s29_s27, %s29_s27 }
  0x1b   :  { %p226_p11 = scmp.ne.s32.totalorder %s29_s27, %s225_s8  ;;  %p231_p13 = scmp.lt.s32.totalorder %s225_s8, %s225_s8 }
  0x1d   :  { %p232_p0 = por %p231_p13, %p230_p12 }
  0x1f   :  { %p233_p1 = pnand %p232_p0, %p226_p11 }
  0x21   :  { %236 = shalt.err (!%p233_p1)
}
  0x22   :  { %34 = dma.hbm_to_vmem [thread:$0]  %s343_s1, 512, %s29_s27, [#allocation6], %s266_s22, %s266_s22, %s267_s23  }
  0x23   :  { %259 = dma.done.wait [#allocation3], 256  }
  0x24   :  { %260 = vsyncadd [#allocation3], 4294967040 }
  0x25   :  { %261 = dma.done.wait [#allocation6], 512  }
  0x26   :  { %262 = vsyncadd [#allocation6], 4294966784  ;;  %vm56_vm0 = vcmask 261120   ;;  %v45_v0 = vld [vmem:[#allocation5] sm:$0xff]  ;;  %v46_v1 = vld [vmem:[#allocation5 + $0x8] sm:$0xff]  ;;  %s269_s11 = smov [#allocation7]  }
  0x27   :  { %v47_v2 = vld [vmem:[#allocation5 + $0x10] sm:$0xff]  ;;  %v180_v3 = vpack.c.bf16 %v46_v1, %v45_v0  ;;  %v48_v4 = vld [vmem:[#allocation5 + $0x18] sm:$0xff]  ;;  %s147_s12 = sshll.u32 %s269_s11, 4  ;;  %s148_s12 = int_to_ptr.vmem [resolvable:$true] %s147_s12 }
  0x28   :  { %v43_v5 = vld [vmem:[#allocation2] sm:$0xff]  ;;  %v184_v6 = vpack.c.bf16 %v48_v4, %v47_v2  ;;  %v44_v7 = vld [vmem:[#allocation2 + $0x8] sm:$0xff]  ;;  %s237_s13 = scalar_lea.vmem %s148_s12, 256  ;;  %p242_p3 = scmp.lt.s32.totalorder %s148_s12, %s148_s12 }
  0x29   :  { %177 = vmatprep.mubr.msk.f32.mxu0 %vm56_vm0, %v43_v5  ;;  %181 = vmatprep.subr.bf16.mxu0 %v180_v3  ;;  %v160_v8 = vld [vmem:[%s344_s2] ss:$0 sm:$0xff]  ;;  %p238_p2 = scmp.ne.s32.totalorder %s148_s12, %s237_s13  ;;  %p243_p4 = scmp.lt.s32.totalorder %s237_s13, %s237_s13 }
  0x2a   :  { %183 = vmatpush3.bf16.msra.mxu0 %v180_v3 }
  0x2b   :  { %185 = vmatprep.subr.bf16.mxu0 %v184_v6  ;;  %p244_p5 = por %p243_p4, %p242_p3 }
  0x2d   :  { %p245_p6 = pnand %p244_p5, %p238_p2 }
  0x2e   :  { %187 = vmatpush3.bf16.msra.mxu0 %v184_v6 }
  0x31   :  { %178 = vmatmul.mubr.msk.f32.vlgmr.msra.gmra.mrb[0].mxu0 %vm56_vm0, %v44_v7 }
 0x104   :  { %v179_v9 = vpop.f32.mrb[0].mxu0 }
 0x105   :  { %v135_v10 = vadd.f32 %v179_v9, %v160_v8  ;;  %v129_v11 = vpop.f32.mrb[1].mxu0 }
 0x106   :  { %v130_v12 = vadd.f32 %v160_v8, %v129_v11 }
 0x107   :  { %v139_v13 = vadd.f32 %v135_v10, %v44_v7 }
 0x108   :  { %v138_v14 = vadd.f32 %v130_v12, %v43_v5 }
 0x109   :  { %141 = vst.msk [vmem:[#allocation7 + $0x8] sm:$0xff] %vm56_vm0, %v139_v13 }
 0x10a   :  { %140 = vst.msk [vmem:[#allocation7] sm:$0xff] %vm56_vm0, %v138_v14 }
 0x10b   :  { %248 = shalt.err (!%p245_p6)
}
 0x10c   :  { %s249_s15 = scalar_lea.hbm %s345_s3, 256 }
 0x10d   :  { %p250_p7 = scmp.ne.s32.totalorder %s345_s3, %s249_s15  ;;  %p253_p8 = scmp.lt.u32.totalorder %s249_s15, %s345_s3 }
 0x10f   :  { %p255_p9 = pnand %p253_p8, %p250_p7 }
 0x111   :  { %258 = shalt.err (!%p255_p9)
}
 0x112   :  { %153 = dma.vmem_to_hbm [thread:$0]  %s148_s12, 256, %s345_s3, [#allocation4], %s266_s22, %s266_s22, %s267_s23  }
 0x113   :  { %263 = dma.done.wait [#allocation4], 256  }
 0x114   :  { %264 = vsyncadd [#allocation4], 4294967040 }
 0x115   :  { %157 = vsyncpa [#allocation3], 1 }
 0x116   :  { %158 = vsyncpa [#allocation6], 1 }
 0x117   :  { %159 = vsyncpa [#allocation4], 1 }

</bundles_post_ra>
